<compile_context>
chip_gen: v6e
topology: v6e:2x2x1
jax: 0.10.0
libtpu: 0.0.40
codegen_flags: <defaults>
</compile_context>

<pallas_src>
import functools
import math

import jax
import jax.numpy as jnp
from jax import lax
from jax.experimental import pallas as pl
from jax.experimental.pallas import tpu as pltpu


def _infonce_kernel(m_ref, t_ref, out_ref, max_sc, sum_sc, pos_sc,
                    *, row_tile: int, col_tile: int):
    i = pl.program_id(0)            # row tile of model_output (lane axis of s)
    j = pl.program_id(1)            # row tile of targets      (sublane axis of s)
    nj = pl.num_programs(1)

    @pl.when(j == 0)
    def _init():
        max_sc[...] = jnp.full_like(max_sc, -jnp.inf)
        sum_sc[...] = jnp.zeros_like(sum_sc)
        pos_sc[...] = jnp.zeros_like(pos_sc)

    # Logits tile, transposed: (TC, TR) = t_n @ m_s.T.  Contracting the last
    # dims of both operands lowers without a separate VMEM transpose (same
    # pattern as q @ k.T in flash attention).  Operands are already normalized
    # (model rows pre-scaled by 1/temperature) and in matmul_dtype; accumulate
    # in f32 on the MXU.
    s = lax.dot_general(t_ref[...], m_ref[...], (((1,), (1,)), ((), ())),
                        preferred_element_type=jnp.float32)

    # Online (streaming) logsumexp across the column tiles.  Statistics are
    # (1, TR) -- lane-dense per model_output row.
    cur_max = jnp.max(s, axis=0, keepdims=True)
    new_max = jnp.maximum(max_sc[...], cur_max)
    alpha = jnp.exp(max_sc[...] - new_max)
    sum_sc[...] = alpha * sum_sc[...] + jnp.sum(jnp.exp(s - new_max),
                                                axis=0, keepdims=True)
    max_sc[...] = new_max

    # Positive-pair logit: take the diagonal entries out of the s tile itself
    # (consistent with the bf16 logits used in the logsumexp).  Correct for
    # row_tile != col_tile: global row r = i*TR + p has its positive in column
    # tile r // TC, so mask per element and accumulate -- a row tile whose
    # diagonal spans several column tiles (TR > TC) contributes piecewise.
    row_start = i * row_tile
    col_start = j * col_tile
    crosses_diag = jnp.logical_and(row_start < col_start + col_tile,
                                   col_start < row_start + row_tile)

    @pl.when(crosses_diag)
    def _diag():
        lane_ids = lax.broadcasted_iota(jnp.int32, s.shape, 1) + row_start
        sub_ids = lax.broadcasted_iota(jnp.int32, s.shape, 0) + col_start
        pos_sc[...] += jnp.sum(jnp.where(lane_ids == sub_ids, s, 0.0),
                               axis=0, keepdims=True)

    @pl.when(j == nj - 1)
    def _finalize():
        # Lane-dense (1, TR) store of per-row (logsumexp - positive_logit).
        out_ref[...] = max_sc[...] + jnp.log(sum_sc[...]) - pos_sc[...]


# Conservative VMEM budgets (fit v7x's 64 MiB physical with headroom; v5e/v6e
# have 128 MiB so this is strictly safe there too).
_VMEM_BUDGET = 40 * 1024 * 1024
_RESIDENT_T_BUDGET = 16 * 1024 * 1024


def _divisors(b: int):
    ds = set()
    for d in range(1, int(math.isqrt(b)) + 1):
        if b % d == 0:
            ds.add(d)
            ds.add(b // d)
    return ds


def _pick_tiles(b: int, d: int, itemsize: int,
                row_tile: int | None, col_tile: int | None):
    """Decoupled (row_tile, col_tile): big TR (HBM re-stream reduction),
    MXU/lane-friendly TC, both divisors of b and sublane-friendly."""
    valid = sorted(x for x in _divisors(b) if x % 8 == 0 or x == b)
    if not valid:
        valid = [b]  # TODO(synk): pad odd batch sizes instead of un-tiled fallback.

    if col_tile is None:
        if 2 * b * d * itemsize <= _RESIDENT_T_BUDGET:
            col_tile = b                       # targets fully resident in VMEM
        else:
            fit = [x for x in valid if x <= 256]
            col_tile = max(fit) if fit else min(valid)

    if row_tile is None:
        per_row = 2 * d * itemsize + 4 * col_tile * 4 + 64   # m block (dbl-buf) + f32 temporaries
        fixed = 2 * col_tile * d * itemsize + (64 << 10)     # t block (dbl-buf) + slack
        cap = max((_VMEM_BUDGET - fixed) // per_row, 8)
        if b >= 16:
            cap = min(cap, b // 2)             # keep >=2 row tiles for v7x's 2 TCs
        fit = [x for x in valid if x <= cap]
        row_tile = max(fit) if fit else min(valid)

    assert b % row_tile == 0 and b % col_tile == 0, (b, row_tile, col_tile)
    return row_tile, col_tile


@functools.partial(jax.jit,
                   static_argnames=("temperature", "weight", "row_tile",
                                    "col_tile", "matmul_dtype"))
def contrastive_infonce_loss(model_output, targets,
                             temperature: float = 0.05,
                             weight: float = 1.0,
                             row_tile: int | None = None,
                             col_tile: int | None = None,
                             matmul_dtype=jnp.bfloat16):
    """Pallas TPU implementation of ContrastiveInfoNCELoss.forward."""
    assert model_output.shape == targets.shape and model_output.ndim == 2
    B, D = model_output.shape
    itemsize = jnp.dtype(matmul_dtype).itemsize
    tr, tc = _pick_tiles(B, D, itemsize, row_tile, col_tile)
    n_row_tiles, n_col_tiles = B // tr, B // tc

    # One fused O(B*D) pre-pass: F.normalize(x, dim=-1) == x * rsqrt(max(|x|^2,
    # eps^2)); fold 1/temperature into the model_output operand and cast both
    # operands to matmul_dtype so the kernel never re-normalizes per tile and
    # streams half the HBM bytes (bf16 default).
    inv_temp = 1.0 / temperature
    m32 = model_output.astype(jnp.float32)
    t32 = targets.astype(jnp.float32)
    m_s = (m32 * (inv_temp * lax.rsqrt(
        jnp.maximum(jnp.sum(m32 * m32, axis=-1, keepdims=True), 1e-24)))
           ).astype(matmul_dtype)
    t_n = (t32 * lax.rsqrt(
        jnp.maximum(jnp.sum(t32 * t32, axis=-1, keepdims=True), 1e-24))
           ).astype(matmul_dtype)

    vmem_est = (2 * (tr + tc) * D * itemsize      # double-buffered input blocks
                + 2 * tr * 4 + 3 * tr * 4         # output block + f32 stats scratch
                + 4 * tc * tr * 4)                # s tile + elementwise temporaries
    vmem_limit = int(min(64 << 20, max(32 << 20, 2 * vmem_est)))

    kernel = functools.partial(_infonce_kernel, row_tile=tr, col_tile=tc)

    per_row = pl.pallas_call(
        kernel,
        out_shape=jax.ShapeDtypeStruct((n_row_tiles, tr), jnp.float32),
        grid_spec=pltpu.PrefetchScalarGridSpec(
            num_scalar_prefetch=0,
            grid=(n_row_tiles, n_col_tiles),
            in_specs=[
                pl.BlockSpec((tr, D), lambda i, j: (i, 0)),   # normalized, 1/T-scaled model rows
                pl.BlockSpec((tc, D), lambda i, j: (j, 0)),   # normalized target rows
            ],
            out_specs=pl.BlockSpec((1, tr), lambda i, j: (i, 0)),  # lane-dense per-row loss
            scratch_shapes=[
                pltpu.VMEM((1, tr), jnp.float32),   # running row max
                pltpu.VMEM((1, tr), jnp.float32),   # running row sum-exp
                pltpu.VMEM((1, tr), jnp.float32),   # positive-pair logit
            ],
        ),
        compiler_params=pltpu.CompilerParams(
            dimension_semantics=("parallel", "arbitrary"),
            vmem_limit_bytes=vmem_limit),
        cost_estimate=pl.CostEstimate(
            flops=2 * B * B * D,
            transcendentals=B * B + 2 * B,
            bytes_accessed=(n_row_tiles + 1) * B * D * itemsize + B * 4),
    )(m_s, t_n)

    # Tiny O(B) finalize (batch mean + loss weight) in the wrapper: parallel
    # row tiles write disjoint output blocks, no cross-core accumulation.
    return weight * jnp.mean(per_row)


def _reference_loss(model_output, targets, temperature=0.05, weight=1.0):
    m = model_output / jnp.maximum(
        jnp.linalg.norm(model_output, axis=-1, keepdims=True), 1e-12)
    t = targets / jnp.maximum(
        jnp.linalg.norm(targets, axis=-1, keepdims=True), 1e-12)
    logits = (m @ t.T) / temperature
    lse = jax.nn.logsumexp(logits, axis=-1)
    diag = jnp.diagonal(logits)
    return weight * jnp.mean(lse - diag)


if __name__ == "__main__":
    key = jax.random.PRNGKey(0)

    # (B, D, row_tile, col_tile, matmul_dtype, atol/rtol)
    #  - case 1: tiny, single-tile, default bf16 path
    #  - case 2: TR < TC  (grid (4,2)) f32, exercises decoupled diag masking
    #  - case 3: TR > TC  (grid (2,4)) f32, diag spans multiple column tiles
    #  - case 4: default bf16 with resident targets (TC == B) and 2 row tiles
    cases = [
        (8,   32,  None, None, jnp.bfloat16, 5e-2),
        (128, 256, 32,   64,   jnp.float32,  1e-4),
        (128, 256, 64,   32,   jnp.float32,  1e-4),
        (256, 128, None, None, jnp.bfloat16, 5e-2),
    ]
    for B, D, rt, ct, mdt, tol in cases:
        k1, k2 = jax.random.split(jax.random.fold_in(key, B * 1000 + D))
        model_output = jax.random.normal(k1, (B, D), dtype=jnp.float32)
        targets = jax.random.normal(k2, (B, D), dtype=jnp.float32)

        loss = contrastive_infonce_loss(model_output, targets,
                                        temperature=0.05, weight=1.0,
                                        row_tile=rt, col_tile=ct,
                                        matmul_dtype=mdt)
        loss = jax.block_until_ready(loss)

        ref = _reference_loss(model_output, targets, temperature=0.05,
                              weight=1.0)
        assert jnp.allclose(loss, ref, atol=tol, rtol=tol), (B, D, loss, ref)

    print("KERNEL_OK")
</pallas_src>

<mosaic_0001>
module attributes {stable_mosaic.version = 11 : i64} {
  func.func @_infonce_kernel(%arg0: i32, %arg1: i32, %arg2: memref<8x32xbf16, #tpu.memory_space<vmem>>, %arg3: memref<8x32xbf16, #tpu.memory_space<vmem>>, %arg4: memref<1x8xf32, #tpu.memory_space<vmem>>, %arg5: memref<1x8xf32, #tpu.memory_space<vmem>>, %arg6: memref<1x8xf32, #tpu.memory_space<vmem>>, %arg7: memref<1x8xf32, #tpu.memory_space<vmem>>) attributes {dimension_semantics = [#tpu.dimension_semantics<parallel>, #tpu.dimension_semantics<arbitrary>], iteration_bounds = array<i64: 1, 1>, scalar_prefetch = 0 : i64, scratch_operands = 3 : i64, tpu.core_type = #tpu.core_type<tc>, window_params = [{transform_indices = @transform_0, window_bounds = array<i64: 8, 32>}, {transform_indices = @transform_1, window_bounds = array<i64: 8, 32>}, {transform_indices = @transform_2, window_bounds = array<i64: 1, 8>}]} {
    %c0_i32 = arith.constant 0 : i32
    %0 = arith.cmpi eq, %arg1, %c0_i32 : i32
    %1 = arith.extui %0 : i1 to i32
    %c0_i32_0 = arith.constant 0 : i32
    %2 = arith.cmpi ne, %1, %c0_i32_0 : i32
    scf.if %2 {
      %cst_22 = arith.constant 0xFF800000 : f32
      %35 = vector.broadcast %cst_22 : f32 to vector<1x8xf32>
      %c0_23 = arith.constant 0 : index
      %c0_24 = arith.constant 0 : index
      %36 = vector.load %arg5[%c0_23, %c0_24] : memref<1x8xf32, #tpu.memory_space<vmem>>, vector<1x8xf32>
      tpu.vector_store %arg5[%c0_23, %c0_24], %35 {strides = array<i32>} : memref<1x8xf32, #tpu.memory_space<vmem>>, vector<1x8xf32>,
      %cst_25 = arith.constant 0.000000e+00 : f32
      %37 = vector.broadcast %cst_25 : f32 to vector<1x8xf32>
      %c0_26 = arith.constant 0 : index
      %c0_27 = arith.constant 0 : index
      %38 = vector.load %arg6[%c0_26, %c0_27] : memref<1x8xf32, #tpu.memory_space<vmem>>, vector<1x8xf32>
      tpu.vector_store %arg6[%c0_26, %c0_27], %37 {strides = array<i32>} : memref<1x8xf32, #tpu.memory_space<vmem>>, vector<1x8xf32>,
      %cst_28 = arith.constant 0.000000e+00 : f32
      %39 = vector.broadcast %cst_28 : f32 to vector<1x8xf32>
      %c0_29 = arith.constant 0 : index
      %c0_30 = arith.constant 0 : index
      %40 = vector.load %arg7[%c0_29, %c0_30] : memref<1x8xf32, #tpu.memory_space<vmem>>, vector<1x8xf32>
      tpu.vector_store %arg7[%c0_29, %c0_30], %39 {strides = array<i32>} : memref<1x8xf32, #tpu.memory_space<vmem>>, vector<1x8xf32>,
    } else {
    }
    %c0 = arith.constant 0 : index
    %c0_1 = arith.constant 0 : index
    %3 = vector.load %arg3[%c0, %c0_1] : memref<8x32xbf16, #tpu.memory_space<vmem>>, vector<8x32xbf16>
    %c0_2 = arith.constant 0 : index
    %c0_3 = arith.constant 0 : index
    %4 = vector.load %arg2[%c0_2, %c0_3] : memref<8x32xbf16, #tpu.memory_space<vmem>>, vector<8x32xbf16>
    %cst = arith.constant dense<0.000000e+00> : vector<8x8xf32>
    %5 = tpu.matmul %3, %4, %cst {dimension_numbers = #tpu.dot_dimension_numbers<[1], [1], [0], [0], [0, 0, 1, 0], [], []>} : vector<8x32xbf16>, vector<8x32xbf16>, vector<8x8xf32> -> vector<8x8xf32>
    %cst_4 = arith.constant dense<0xFF800000> : vector<8xf32>
    %6 = vector.multi_reduction <maximumf>, %5, %cst_4 [0] : vector<8x8xf32> to vector<8xf32>
    %7 = vector.shape_cast %6 : vector<8xf32> to vector<1x8xf32>
    %c0_5 = arith.constant 0 : index
    %c0_6 = arith.constant 0 : index
    %8 = vector.load %arg5[%c0_5, %c0_6] : memref<1x8xf32, #tpu.memory_space<vmem>>, vector<1x8xf32>
    %9 = arith.maximumf %8, %7 : vector<1x8xf32>
    %c0_7 = arith.constant 0 : index
    %c0_8 = arith.constant 0 : index
    %10 = vector.load %arg5[%c0_7, %c0_8] : memref<1x8xf32, #tpu.memory_space<vmem>>, vector<1x8xf32>
    %11 = arith.subf %10, %9 : vector<1x8xf32>
    %12 = math.exp %11 : vector<1x8xf32>
    %c0_9 = arith.constant 0 : index
    %c0_10 = arith.constant 0 : index
    %13 = vector.load %arg6[%c0_9, %c0_10] : memref<1x8xf32, #tpu.memory_space<vmem>>, vector<1x8xf32>
    %14 = arith.mulf %12, %13 : vector<1x8xf32>
    %15 = vector.broadcast %9 : vector<1x8xf32> to vector<8x8xf32>
    %16 = arith.subf %5, %15 : vector<8x8xf32>
    %17 = math.exp %16 : vector<8x8xf32>
    %cst_11 = arith.constant dense<0.000000e+00> : vector<8xf32>
    %18 = vector.multi_reduction <add>, %17, %cst_11 [0] : vector<8x8xf32> to vector<8xf32>
    %19 = vector.shape_cast %18 : vector<8xf32> to vector<1x8xf32>
    %20 = arith.addf %14, %19 : vector<1x8xf32>
    %c0_12 = arith.constant 0 : index
    %c0_13 = arith.constant 0 : index
    %21 = vector.load %arg6[%c0_12, %c0_13] : memref<1x8xf32, #tpu.memory_space<vmem>>, vector<1x8xf32>
    tpu.vector_store %arg6[%c0_12, %c0_13], %20 {strides = array<i32>} : memref<1x8xf32, #tpu.memory_space<vmem>>, vector<1x8xf32>,
    %c0_14 = arith.constant 0 : index
    %c0_15 = arith.constant 0 : index
    %22 = vector.load %arg5[%c0_14, %c0_15] : memref<1x8xf32, #tpu.memory_space<vmem>>, vector<1x8xf32>
    tpu.vector_store %arg5[%c0_14, %c0_15], %9 {strides = array<i32>} : memref<1x8xf32, #tpu.memory_space<vmem>>, vector<1x8xf32>,
    %c8_i32 = arith.constant 8 : i32
    %23 = arith.muli %arg0, %c8_i32 : i32
    %c8_i32_16 = arith.constant 8 : i32
    %24 = arith.muli %arg1, %c8_i32_16 : i32
    %c8_i32_17 = arith.constant 8 : i32
    %25 = arith.addi %24, %c8_i32_17 : i32
    %26 = arith.cmpi slt, %23, %25 : i32
    %c8_i32_18 = arith.constant 8 : i32
    %27 = arith.addi %23, %c8_i32_18 : i32
    %28 = arith.cmpi slt, %24, %27 : i32
    %29 = arith.andi %26, %28 : i1
    %30 = arith.extui %29 : i1 to i32
    %c0_i32_19 = arith.constant 0 : i32
    %31 = arith.cmpi ne, %30, %c0_i32_19 : i32
    scf.if %31 {
      %35 = tpu.iota {dimensions = array<i32: 1>} : vector<8x8xi32>
      %36 = vector.broadcast %23 : i32 to vector<8x8xi32>
      %37 = arith.addi %35, %36 : vector<8x8xi32>
      %38 = tpu.iota {dimensions = array<i32: 0>} : vector<8x8xi32>
      %39 = vector.broadcast %24 : i32 to vector<8x8xi32>
      %40 = arith.addi %38, %39 : vector<8x8xi32>
      %c0_22 = arith.constant 0 : index
      %c0_23 = arith.constant 0 : index
      %41 = vector.load %arg7[%c0_22, %c0_23] : memref<1x8xf32, #tpu.memory_space<vmem>>, vector<1x8xf32>
      %42 = arith.cmpi eq, %37, %40 : vector<8x8xi32>
      %cst_24 = arith.constant 0.000000e+00 : f32
      %43 = vector.broadcast %cst_24 : f32 to vector<8x8xf32>
      %44 = arith.select %42, %5, %43 : vector<8x8xi1>, vector<8x8xf32>
      %cst_25 = arith.constant dense<0.000000e+00> : vector<8xf32>
      %45 = vector.multi_reduction <add>, %44, %cst_25 [0] : vector<8x8xf32> to vector<8xf32>
      %46 = vector.shape_cast %45 : vector<8xf32> to vector<1x8xf32>
      %47 = arith.addf %41, %46 : vector<1x8xf32>
      %c0_26 = arith.constant 0 : index
      %c0_27 = arith.constant 0 : index
      %48 = vector.load %arg7[%c0_26, %c0_27] : memref<1x8xf32, #tpu.memory_space<vmem>>, vector<1x8xf32>
      tpu.vector_store %arg7[%c0_26, %c0_27], %47 {strides = array<i32>} : memref<1x8xf32, #tpu.memory_space<vmem>>, vector<1x8xf32>,
    } else {
    }
    %c0_i32_20 = arith.constant 0 : i32
    %32 = arith.cmpi eq, %arg1, %c0_i32_20 : i32
    %33 = arith.extui %32 : i1 to i32
    %c0_i32_21 = arith.constant 0 : i32
    %34 = arith.cmpi ne, %33, %c0_i32_21 : i32
    scf.if %34 {
      %c0_22 = arith.constant 0 : index
      %c0_23 = arith.constant 0 : index
      %35 = vector.load %arg5[%c0_22, %c0_23] : memref<1x8xf32, #tpu.memory_space<vmem>>, vector<1x8xf32>
      %c0_24 = arith.constant 0 : index
      %c0_25 = arith.constant 0 : index
      %36 = vector.load %arg6[%c0_24, %c0_25] : memref<1x8xf32, #tpu.memory_space<vmem>>, vector<1x8xf32>
      %37 = math.log %36 : vector<1x8xf32>
      %38 = arith.addf %35, %37 : vector<1x8xf32>
      %c0_26 = arith.constant 0 : index
      %c0_27 = arith.constant 0 : index
      %39 = vector.load %arg7[%c0_26, %c0_27] : memref<1x8xf32, #tpu.memory_space<vmem>>, vector<1x8xf32>
      %40 = arith.subf %38, %39 : vector<1x8xf32>
      %c0_28 = arith.constant 0 : index
      %c0_29 = arith.constant 0 : index
      %41 = vector.load %arg4[%c0_28, %c0_29] : memref<1x8xf32, #tpu.memory_space<vmem>>, vector<1x8xf32>
      tpu.vector_store %arg4[%c0_28, %c0_29], %40 {strides = array<i32>} : memref<1x8xf32, #tpu.memory_space<vmem>>, vector<1x8xf32>,
    } else {
    }
    return
  }
  func.func @transform_0(%arg0: i32, %arg1: i32) -> (i32, i32) {
    %c0_i32 = arith.constant 0 : i32
    %c0_i32_0 = arith.constant 0 : i32
    return %arg0, %c0_i32 : i32, i32
  }
  func.func @transform_1(%arg0: i32, %arg1: i32) -> (i32, i32) {
    %c0_i32 = arith.constant 0 : i32
    %c0_i32_0 = arith.constant 0 : i32
    return %arg1, %c0_i32 : i32, i32
  }
  func.func @transform_2(%arg0: i32, %arg1: i32) -> (i32, i32) {
    %c0_i32 = arith.constant 0 : i32
    %c0_i32_0 = arith.constant 0 : i32
    return %arg0, %c0_i32 : i32, i32
  }
}

</mosaic_0001>

<bundles_post_ra>
// kernel: contrastive_infonce_loss.1
= control target key start
LH: loop header
LB: loop body
LE: loop exit
PB: predicated region body
PF: predicated region fallthrough
CT: control target
= control target key end

     0   :  { %vm16_vm0 = vcmask 57344   ;;  %vm22_vm1 = vcmask 261120   ;;  %v167_v0 = vmov 0.0   ;;  %vm168_vm2 = vmmov 0   ;;  %s204_s0 = inlined_call_operand.vmem [shape: bf16[8,32], index: 0, kind: input, shape index: {}]   ;;  %s205_s1 = inlined_call_operand.vmem [shape: bf16[8,32], index: 1, kind: input, shape index: {}]   ;;  %s206_s2 = inlined_call_operand.vmem [shape: f32[1,8], index: 2, kind: output, shape index: {}]  }
   0x1   :  { %18 = vst.msk [vmem:[#allocation3] sm:$0x1] %vm16_vm0, %v167_v0  ;;  %19 = vst.msk [vmem:[#allocation4] sm:$0x1] %vm16_vm0, %v167_v0  ;;  %152 = vmatprep.subr.bf16.mxu0 %v167_v0  ;;  %v21_v1 = vld [vmem:[%s204_s0] sm:$0xf]  ;;  %154 = vmatprep.mubr.msk.bf16.mxu0 %vm168_vm2, %v167_v0  ;;  %v85_v5 = vlaneseq }
   0x2   :  { %v27_v2 = vsel %vm22_vm1, %v21_v1, 0  ;;  %v169_v3 = vmov -inf   ;;  %v20_v4 = vld [vmem:[%s205_s1] sm:$0xf]  ;;  %vm69_vm3 = vcmask 64512  }
   0x3   :  { %17 = vst.msk [vmem:[#allocation2] sm:$0x1] %vm16_vm0, %v169_v3  ;;  %153 = vmatpush3.bf16.xpose.msra.mxu0 %v27_v2  ;;  %v86_v6 = vshrl.u32 %v85_v5, 7  ;;  %v115_v7 = vand.u32 127, %v85_v5 }
   0x5   :  { %vm123_vm4 = vcmp.eq.s32.totalorder %v115_v7, %v86_v6  ;;  %v87_v27 = vsub.s32 0, %v86_v6 }
   0x8   :  { %v122_v28 = vld [vmem:[#allocation4] sm:$0x1]  ;;  %v82_v44 = vld [vmem:[#allocation3] sm:$0x1] }
   0xa   :  { %155 = vmatmul.mubr.msk.bf16.vlgmr.msra.gmra.mxu0 %vm22_vm1, %v20_v4  ;;  %v77_v24 = vld [vmem:[#allocation2] sm:$0x1] }
  0xca   :  { %v63_v8 = vpop.f32.mrf.mxu0 }
  0xcb   :  { %v70_v9 = vsel %vm69_vm3, %v63_v8, -inf  ;;  %v124_v10 = vsel %vm123_vm4, %v63_v8, 0.0 }
  0xcc   :  { %v71_v11 = vrot.slane %v70_v9, 4  ;;  %v125_v12 = vsel %vm69_vm3, %v124_v10, 0.0  ;;  %v156_v13 = vpop.f32.mrf.mxu0 }
  0xcd   :  { %v126_v14 = vrot.slane %v125_v12, 4 }
  0xce   :  { %v72_v15 = vmax.f32 %v70_v9, %v71_v11  ;;  %v66_v16 = vpop.f32.mrf.mxu0 }
  0xcf   :  { %v127_v17 = vadd.f32 %v126_v14, %v125_v12 }
  0xd0   :  { %v73_v18 = vrot.slane %v72_v15, 2  ;;  %v157_v19 = vpop.f32.mrf.mxu0 }
  0xd1   :  { %v128_v20 = vrot.slane %v127_v17, 2 }
  0xd2   :  { %v74_v21 = vmax.f32 %v72_v15, %v73_v18 }
  0xd3   :  { %v129_v22 = vadd.f32 %v128_v20, %v127_v17 }
  0xd4   :  { %v75_v23 = vrot.slane %v74_v21, 1 }
  0xd5   :  { %v130_v25 = vrot.slane %v129_v22, 1 }
  0xd6   :  { %v76_v26 = vmax.f32 %v74_v21, %v75_v23 }
  0xd7   :  { %v131_v29 = vadd.f32 %v130_v25, %v129_v22 }
  0xd8   :  { %v78_v30 = vmax.f32 %v77_v24, %v76_v26 }
  0xd9   :  { %v132_v31 = vadd.f32 %v131_v29, %v122_v28 }
  0xda   :  { %v88_v32 = vrot.slane %v78_v30, %v87_v27  ;;  %103 = vst.msk [vmem:[#allocation2] sm:$0x1] %vm16_vm0, %v78_v30  ;;  %v79_v35 = vsub.f32 %v77_v24, %v78_v30 }
  0xdb   :  { %133 = vst.msk [vmem:[#allocation4] sm:$0x1] %vm16_vm0, %v132_v31 }
  0xdc   :  { %v90_v33 = vsub.f32 %v63_v8, %v88_v32  ;;  %v80_v36 = vmul.f32 1.442695, %v79_v35 }
  0xde   :  { %v91_v34 = vmul.f32 1.442695, %v90_v33 }
  0xe0   :  { %161 = vpow2.f32 %v91_v34 }
  0xe1   :  { %163 = vpow2.f32 %v80_v36  ;;  %v137_v52 = vld [vmem:[#allocation2] sm:$0x1] }
  0xe2   :  { %v142_v54 = vld [vmem:[#allocation4] sm:$0x1] }
  0xed   :  { %v162_v37 = vpop.eup %161 }
  0xee   :  { %v93_v38 = vsel %vm69_vm3, %v162_v37, 0.0  ;;  %v164_v43 = vpop.eup %163 }
  0xef   :  { %v94_v39 = vrot.slane %v93_v38, 4  ;;  %v83_v46 = vmul.f32 %v164_v43, %v82_v44 }
  0xf1   :  { %v95_v40 = vadd.f32 %v94_v39, %v93_v38 }
  0xf3   :  { %v96_v41 = vrot.slane %v95_v40, 2 }
  0xf5   :  { %v97_v42 = vadd.f32 %v96_v41, %v95_v40 }
  0xf7   :  { %v98_v45 = vrot.slane %v97_v42, 1 }
  0xf9   :  { %v99_v47 = vadd.f32 %v98_v45, %v97_v42 }
  0xfb   :  { %v100_v48 = vadd.f32 %v99_v47, %v83_v46 }
  0xfd   :  { %102 = vst.msk [vmem:[#allocation3] sm:$0x1] %vm16_vm0, %v100_v48 }
 0x104   :  { %v138_v49 = vld [vmem:[#allocation3] sm:$0x1] }
 0x105   :  { %165 = vlog2.f32 %v138_v49 }
 0x112   :  { %v166_v50 = vpop.eup %165 }
 0x113   :  { %v140_v51 = vmul.f32 0.6931472, %v166_v50 }
 0x115   :  { %v141_v53 = vadd.f32 %v140_v51, %v137_v52 }
 0x117   :  { %v143_v55 = vsub.f32 %v141_v53, %v142_v54 }
 0x119   :  { %144 = vst.msk [vmem:[%s206_s2] sm:$0x1] %vm16_vm0, %v143_v55 }

</bundles_post_ra>
